<compile_context>
chip_gen: v6e
topology: v6e:2x2x1
jax: 0.10.0
libtpu: 0.0.40
codegen_flags: <defaults>
</compile_context>

<pallas_src>
import functools

import jax
import jax.numpy as jnp
from jax import lax
from jax.experimental import pallas as pl
from jax.experimental.pallas import tpu as pltpu

LANE = 128                 # lane width: feature dims are zero-padded to this inside VMEM
SUBLANE = 8                # sublane multiple for the batch (row) dim
IN_FEATURES = 2
OUT_FEATURES = 10
UNROLL_LAYER_LIMIT = 16    # statically unroll the hidden-layer loop up to this depth


def _mlp_kernel(x_ref, w_ref, b_ref, o_ref, *, num_layers):
    """Fused MLP: (Linear + ELU) x num_layers, then the output Linear.

    x_ref: (tm, 2)                     raw (unpadded) input rows
    w_ref: (num_layers+1, 128, 128)    stacked zero-padded weights, (in, out) layout
    b_ref: (num_layers+1, 1, 128)      stacked zero-padded biases
    o_ref: (tm, 10)                    output logits

    Intermediate activations never leave vregs/VMEM.  Padded weight rows/cols and biases
    are zero and ELU(0) == 0, so padding stays inert through the whole stack.
    """
    x = x_ref[...].astype(jnp.float32)                      # (tm, 2)

    def elu(y):
        # ELU(alpha=1): y if y > 0 else exp(y) - 1.  (exp-1 kept: matches reference; the
        # exp runs in the EUP slot either way.)
        return jnp.where(y > 0.0, y, jnp.exp(y) - 1.0)

    # ---- Layer 0: contraction length is only 2, so use two broadcast FMAs on the VPU.
    # This avoids padding x to 128 lanes (review item 1) and a pointless K=128 MXU pass.
    w0 = w_ref[0]                                            # (128, 128); rows >= 2 are zero
    y0 = x[:, 0:1] * w0[0:1, :] + x[:, 1:2] * w0[1:2, :] + b_ref[0]
    h = elu(y0)                                              # (tm, 128)

    # ---- Hidden layers 1 .. num_layers-1 (h1 -> h1) on the MXU.
    def hidden(h, w, b):
        return elu(jnp.dot(h, w, preferred_element_type=jnp.float32) + b)

    if num_layers - 1 <= UNROLL_LAYER_LIMIT:
        for layer in range(1, num_layers):
            h = hidden(h, w_ref[layer], b_ref[layer])
    else:
        # Layers are serially dependent, so unrolling buys nothing; a compact fori_loop
        # body (dynamic first-axis index into the stacked refs) keeps compile time bounded.
        h = lax.fori_loop(1, num_layers,
                          lambda l, h: hidden(h, w_ref[l], b_ref[l]),
                          h, unroll=2)

    # ---- Output layer (no activation); only the first 10 lanes are meaningful.
    out = jnp.dot(h, w_ref[num_layers], preferred_element_type=jnp.float32) + b_ref[num_layers]
    o_ref[...] = out[:, :OUT_FEATURES].astype(o_ref.dtype)


def init_params(key, h1, num_layers):
    """PyTorch nn.Linear-style init (U(-1/sqrt(fan_in), 1/sqrt(fan_in))).

    Returns (raw_params, padded_params):
      raw_params    : list of (w_t (in,out), b (out,)) for the pure-JAX reference
      padded_params : (w_stack (L+1,128,128), b_stack (L+1,1,128)) for the fused kernel
    """
    dims = [IN_FEATURES] + [h1] * num_layers + [OUT_FEATURES]
    raw = []
    for i in range(len(dims) - 1):
        fan_in, fan_out = dims[i], dims[i + 1]
        key, kw, kb = jax.random.split(key, 3)
        bound = 1.0 / jnp.sqrt(jnp.float32(fan_in))
        # weights stored transposed: (in_features, out_features) -> lane-dense output axis
        w_t = jax.random.uniform(kw, (fan_in, fan_out), jnp.float32, -bound, bound)
        b = jax.random.uniform(kb, (fan_out,), jnp.float32, -bound, bound)
        raw.append((w_t, b))

    n_total = num_layers + 1
    w_stack = jnp.zeros((n_total, LANE, LANE), jnp.float32)
    b_stack = jnp.zeros((n_total, 1, LANE), jnp.float32)
    for i, (w_t, b) in enumerate(raw):
        w_stack = w_stack.at[i, : w_t.shape[0], : w_t.shape[1]].set(w_t)
        b_stack = b_stack.at[i, 0, : b.shape[0]].set(b)
    return raw, (w_stack, b_stack)


def _round_up(x, m):
    return ((x + m - 1) // m) * m


def model_dynamic_forward(padded_params, x, num_layers):
    """Forward pass of Model_dynamic as a single fused pallas_call."""
    w_stack, b_stack = padded_params
    n_total = num_layers + 1
    M = x.shape[0]

    # Batch (row) tiling:
    #  * tiny batches -> one block;
    #  * 128 < M <= 1024 -> tm=128 so the 'parallel' axis has >= 2 steps (v7x megacore);
    #  * large batches -> tm=512 to amortize per-grid-step overhead (~85% of HBM roofline).
    if M <= 128:
        tm = _round_up(max(M, 1), SUBLANE)
    elif M <= 1024:
        tm = 128
    else:
        tm = 512
    grid = pl.cdiv(M, tm)
    # Boundary blocks (tm not dividing M) are padded by Pallas with unspecified values;
    # rows never mix across the matmuls, so those extra rows are simply discarded.

    # Weights/biases are grid-resident (constant index_map).  Once the stack is large,
    # single-buffer them (double-buffering data that never changes wastes VMEM) and raise
    # the scoped VMEM limit so deep stacks still compile (16 MiB default on v5e).
    w_bytes = n_total * LANE * LANE * 4
    b_bytes = n_total * LANE * 4
    single_buffer_weights = w_bytes > (4 << 20)
    wb_kwargs = {"pipeline_mode": pl.Buffered(1)} if single_buffer_weights else {}

    n_wb_bufs = 1 if single_buffer_weights else 2
    vmem_est = (n_wb_bufs * (w_bytes + b_bytes)
                + 2 * (tm * LANE * 4)              # double-buffered output blocks (lane-padded)
                + 2 * (tm * LANE * 4)              # input blocks + activation headroom
                + (2 << 20))
    compiler_kwargs = dict(dimension_semantics=("parallel",))
    if vmem_est > (12 << 20):
        compiler_kwargs["vmem_limit_bytes"] = int(min(vmem_est, 100 << 20))

    kernel = functools.partial(_mlp_kernel, num_layers=num_layers)
    out = pl.pallas_call(
        kernel,
        out_shape=jax.ShapeDtypeStruct((M, OUT_FEATURES), jnp.float32),
        grid_spec=pltpu.PrefetchScalarGridSpec(
            num_scalar_prefetch=0,
            grid=(grid,),
            in_specs=[
                # x passed UNPADDED: block last dim == full array dim (2) is legal and
                # avoids materializing a 64x-inflated padded copy of x in HBM.
                pl.BlockSpec((tm, IN_FEATURES), lambda i: (i, 0)),
                pl.BlockSpec((n_total, LANE, LANE), lambda i: (0, 0, 0), **wb_kwargs),
                pl.BlockSpec((n_total, 1, LANE), lambda i: (0, 0, 0), **wb_kwargs),
            ],
            # Direct (tm, 10) output block (== full dim): only real logits hit HBM and the
            # wrapper-side slice kernel is gone.
            out_specs=pl.BlockSpec((tm, OUT_FEATURES), lambda i: (i, 0)),
        ),
        compiler_params=pltpu.CompilerParams(**compiler_kwargs),
    )(x, w_stack, b_stack)
    return out


def _reference_forward(raw_params, x, num_layers):
    """Pure-JAX reference (unpadded), matching PyTorch semantics."""
    h = x
    for i in range(num_layers):
        w_t, b = raw_params[i]
        y = h @ w_t + b
        h = jnp.where(y > 0.0, y, jnp.exp(y) - 1.0)
    w_t, b = raw_params[num_layers]
    return h @ w_t + b


if __name__ == "__main__":
    h1 = 32
    num_layers = 3
    batch = 8

    key = jax.random.PRNGKey(0)
    key, kx = jax.random.split(key)
    x = jax.random.normal(kx, (batch, IN_FEATURES), jnp.float32)

    raw_params, padded_params = init_params(key, h1, num_layers)

    out = model_dynamic_forward(padded_params, x, num_layers)
    out = jax.block_until_ready(out)

    ref = _reference_forward(raw_params, x, num_layers)
    assert out.shape == (batch, OUT_FEATURES), f"bad output shape {out.shape}"
    assert jnp.allclose(out, ref, atol=1e-4, rtol=1e-4), "Pallas output mismatch vs reference"

    print("KERNEL_OK")
</pallas_src>

<mosaic_0001>
module attributes {stable_mosaic.version = 11 : i64} {
  func.func @_mlp_kernel(%arg0: i32, %arg1: memref<8x2xf32, #tpu.memory_space<vmem>>, %arg2: memref<4x128x128xf32, #tpu.memory_space<vmem>>, %arg3: memref<4x1x128xf32, #tpu.memory_space<vmem>>, %arg4: memref<8x10xf32, #tpu.memory_space<vmem>>) attributes {dimension_semantics = [#tpu.dimension_semantics<parallel>], iteration_bounds = array<i64: 1>, scalar_prefetch = 0 : i64, scratch_operands = 0 : i64, tpu.core_type = #tpu.core_type<tc>, window_params = [{transform_indices = @transform_0, window_bounds = array<i64: 8, 2>}, {pipeline_mode = #tpu.pipeline_mode<synchronous>, transform_indices = @transform_1, window_bounds = array<i64: 4, 128, 128>}, {pipeline_mode = #tpu.pipeline_mode<synchronous>, transform_indices = @transform_2, window_bounds = array<i64: 4, 1, 128>}, {transform_indices = @transform_3, window_bounds = array<i64: 8, 10>}]} {
    %c0 = arith.constant 0 : index
    %c0_0 = arith.constant 0 : index
    %0 = vector.load %arg1[%c0, %c0_0] : memref<8x2xf32, #tpu.memory_space<vmem>>, vector<8x2xf32>
    %c0_1 = arith.constant 0 : index
    %c0_2 = arith.constant 0 : index
    %c0_3 = arith.constant 0 : index
    %1 = vector.load %arg2[%c0_1, %c0_2, %c0_3] : memref<4x128x128xf32, #tpu.memory_space<vmem>>, vector<1x128x128xf32>
    %2 = vector.shape_cast %1 : vector<1x128x128xf32> to vector<128x128xf32>
    %3 = vector.extract_strided_slice %0 {offsets = [0, 0], sizes = [8, 1], strides = [1, 1]} : vector<8x2xf32> to vector<8x1xf32>
    %4 = vector.extract_strided_slice %2 {offsets = [0, 0], sizes = [1, 128], strides = [1, 1]} : vector<128x128xf32> to vector<1x128xf32>
    %5 = vector.broadcast %3 : vector<8x1xf32> to vector<8x128xf32>
    %6 = vector.broadcast %4 : vector<1x128xf32> to vector<8x128xf32>
    %7 = arith.mulf %5, %6 : vector<8x128xf32>
    %8 = vector.extract_strided_slice %0 {offsets = [0, 1], sizes = [8, 1], strides = [1, 1]} : vector<8x2xf32> to vector<8x1xf32>
    %9 = vector.extract_strided_slice %2 {offsets = [1, 0], sizes = [1, 128], strides = [1, 1]} : vector<128x128xf32> to vector<1x128xf32>
    %10 = vector.broadcast %8 : vector<8x1xf32> to vector<8x128xf32>
    %11 = vector.broadcast %9 : vector<1x128xf32> to vector<8x128xf32>
    %12 = arith.mulf %10, %11 : vector<8x128xf32>
    %13 = arith.addf %7, %12 : vector<8x128xf32>
    %c0_4 = arith.constant 0 : index
    %c0_5 = arith.constant 0 : index
    %c0_6 = arith.constant 0 : index
    %14 = vector.load %arg3[%c0_4, %c0_5, %c0_6] : memref<4x1x128xf32, #tpu.memory_space<vmem>>, vector<1x1x128xf32>
    %15 = vector.shape_cast %14 : vector<1x1x128xf32> to vector<1x128xf32>
    %16 = vector.broadcast %15 : vector<1x128xf32> to vector<8x128xf32>
    %17 = arith.addf %13, %16 : vector<8x128xf32>
    %cst = arith.constant 0.000000e+00 : f32
    %18 = vector.broadcast %cst : f32 to vector<8x128xf32>
    %19 = arith.cmpf ogt, %17, %18 : vector<8x128xf32>
    %20 = math.exp %17 : vector<8x128xf32>
    %cst_7 = arith.constant 1.000000e+00 : f32
    %21 = vector.broadcast %cst_7 : f32 to vector<8x128xf32>
    %22 = arith.subf %20, %21 : vector<8x128xf32>
    %23 = arith.select %19, %17, %22 : vector<8x128xi1>, vector<8x128xf32>
    %c1 = arith.constant 1 : index
    %c0_8 = arith.constant 0 : index
    %c0_9 = arith.constant 0 : index
    %24 = vector.load %arg2[%c1, %c0_8, %c0_9] : memref<4x128x128xf32, #tpu.memory_space<vmem>>, vector<1x128x128xf32>
    %25 = vector.shape_cast %24 : vector<1x128x128xf32> to vector<128x128xf32>
    %c1_10 = arith.constant 1 : index
    %c0_11 = arith.constant 0 : index
    %c0_12 = arith.constant 0 : index
    %26 = vector.load %arg3[%c1_10, %c0_11, %c0_12] : memref<4x1x128xf32, #tpu.memory_space<vmem>>, vector<1x1x128xf32>
    %27 = vector.shape_cast %26 : vector<1x1x128xf32> to vector<1x128xf32>
    %cst_13 = arith.constant dense<0.000000e+00> : vector<8x128xf32>
    %28 = tpu.matmul %23, %25, %cst_13 {dimension_numbers = #tpu.dot_dimension_numbers<[1], [0], [0], [1], [0, 0, 1, 1], [], []>} : vector<8x128xf32>, vector<128x128xf32>, vector<8x128xf32> -> vector<8x128xf32>
    %29 = vector.broadcast %27 : vector<1x128xf32> to vector<8x128xf32>
    %30 = arith.addf %28, %29 : vector<8x128xf32>
    %cst_14 = arith.constant 0.000000e+00 : f32
    %31 = vector.broadcast %cst_14 : f32 to vector<8x128xf32>
    %32 = arith.cmpf ogt, %30, %31 : vector<8x128xf32>
    %33 = math.exp %30 : vector<8x128xf32>
    %cst_15 = arith.constant 1.000000e+00 : f32
    %34 = vector.broadcast %cst_15 : f32 to vector<8x128xf32>
    %35 = arith.subf %33, %34 : vector<8x128xf32>
    %36 = arith.select %32, %30, %35 : vector<8x128xi1>, vector<8x128xf32>
    %c2 = arith.constant 2 : index
    %c0_16 = arith.constant 0 : index
    %c0_17 = arith.constant 0 : index
    %37 = vector.load %arg2[%c2, %c0_16, %c0_17] : memref<4x128x128xf32, #tpu.memory_space<vmem>>, vector<1x128x128xf32>
    %38 = vector.shape_cast %37 : vector<1x128x128xf32> to vector<128x128xf32>
    %c2_18 = arith.constant 2 : index
    %c0_19 = arith.constant 0 : index
    %c0_20 = arith.constant 0 : index
    %39 = vector.load %arg3[%c2_18, %c0_19, %c0_20] : memref<4x1x128xf32, #tpu.memory_space<vmem>>, vector<1x1x128xf32>
    %40 = vector.shape_cast %39 : vector<1x1x128xf32> to vector<1x128xf32>
    %cst_21 = arith.constant dense<0.000000e+00> : vector<8x128xf32>
    %41 = tpu.matmul %36, %38, %cst_21 {dimension_numbers = #tpu.dot_dimension_numbers<[1], [0], [0], [1], [0, 0, 1, 1], [], []>} : vector<8x128xf32>, vector<128x128xf32>, vector<8x128xf32> -> vector<8x128xf32>
    %42 = vector.broadcast %40 : vector<1x128xf32> to vector<8x128xf32>
    %43 = arith.addf %41, %42 : vector<8x128xf32>
    %cst_22 = arith.constant 0.000000e+00 : f32
    %44 = vector.broadcast %cst_22 : f32 to vector<8x128xf32>
    %45 = arith.cmpf ogt, %43, %44 : vector<8x128xf32>
    %46 = math.exp %43 : vector<8x128xf32>
    %cst_23 = arith.constant 1.000000e+00 : f32
    %47 = vector.broadcast %cst_23 : f32 to vector<8x128xf32>
    %48 = arith.subf %46, %47 : vector<8x128xf32>
    %49 = arith.select %45, %43, %48 : vector<8x128xi1>, vector<8x128xf32>
    %c3 = arith.constant 3 : index
    %c0_24 = arith.constant 0 : index
    %c0_25 = arith.constant 0 : index
    %50 = vector.load %arg2[%c3, %c0_24, %c0_25] : memref<4x128x128xf32, #tpu.memory_space<vmem>>, vector<1x128x128xf32>
    %51 = vector.shape_cast %50 : vector<1x128x128xf32> to vector<128x128xf32>
    %cst_26 = arith.constant dense<0.000000e+00> : vector<8x128xf32>
    %52 = tpu.matmul %49, %51, %cst_26 {dimension_numbers = #tpu.dot_dimension_numbers<[1], [0], [0], [1], [0, 0, 1, 1], [], []>} : vector<8x128xf32>, vector<128x128xf32>, vector<8x128xf32> -> vector<8x128xf32>
    %c3_27 = arith.constant 3 : index
    %c0_28 = arith.constant 0 : index
    %c0_29 = arith.constant 0 : index
    %53 = vector.load %arg3[%c3_27, %c0_28, %c0_29] : memref<4x1x128xf32, #tpu.memory_space<vmem>>, vector<1x1x128xf32>
    %54 = vector.shape_cast %53 : vector<1x1x128xf32> to vector<1x128xf32>
    %55 = vector.broadcast %54 : vector<1x128xf32> to vector<8x128xf32>
    %56 = arith.addf %52, %55 : vector<8x128xf32>
    %57 = vector.extract_strided_slice %56 {offsets = [0, 0], sizes = [8, 10], strides = [1, 1]} : vector<8x128xf32> to vector<8x10xf32>
    %c0_30 = arith.constant 0 : index
    %c0_31 = arith.constant 0 : index
    %58 = vector.load %arg4[%c0_30, %c0_31] : memref<8x10xf32, #tpu.memory_space<vmem>>, vector<8x10xf32>
    tpu.vector_store %arg4[%c0_30, %c0_31], %57 {strides = array<i32>} : memref<8x10xf32, #tpu.memory_space<vmem>>, vector<8x10xf32>,
    return
  }
  func.func @transform_0(%arg0: i32) -> (i32, i32) {
    %c0_i32 = arith.constant 0 : i32
    %c0_i32_0 = arith.constant 0 : i32
    return %arg0, %c0_i32 : i32, i32
  }
  func.func @transform_1(%arg0: i32) -> (i32, i32, i32) {
    %c0_i32 = arith.constant 0 : i32
    %c0_i32_0 = arith.constant 0 : i32
    %c0_i32_1 = arith.constant 0 : i32
    %c0_i32_2 = arith.constant 0 : i32
    return %c0_i32, %c0_i32_0, %c0_i32_1 : i32, i32, i32
  }
  func.func @transform_2(%arg0: i32) -> (i32, i32, i32) {
    %c0_i32 = arith.constant 0 : i32
    %c0_i32_0 = arith.constant 0 : i32
    %c0_i32_1 = arith.constant 0 : i32
    %c0_i32_2 = arith.constant 0 : i32
    return %c0_i32, %c0_i32_0, %c0_i32_1 : i32, i32, i32
  }
  func.func @transform_3(%arg0: i32) -> (i32, i32) {
    %c0_i32 = arith.constant 0 : i32
    %c0_i32_0 = arith.constant 0 : i32
    return %arg0, %c0_i32 : i32, i32
  }
}

</mosaic_0001>

<bundles_post_ra>
// kernel: tpu_custom_call.1
= control target key start
LH: loop header
LB: loop body
LE: loop exit
PB: predicated region body
PF: predicated region fallthrough
CT: control target
= control target key end

     0   :  { %8 = vsyncpa [#allocation3], 0  ;;  %s705_s0 = inlined_call_operand.vmem [shape: f32[8,2], index: 0, kind: input, shape index: {}]   ;;  %s706_s1 = inlined_call_operand.hbm [shape: f32[4,128,128], index: 1, kind: input, shape index: {}]   ;;  %s707_s2 = inlined_call_operand.vmem [shape: f32[4,1,128], index: 2, kind: input, shape index: {}]   ;;  %s708_s3 = inlined_call_operand.hbm [shape: f32[8,10], index: 3, kind: output, shape index: {}]  }
   0x1   :  { %9 = vsyncpa [#allocation4], 0  ;;  %s602_s12 = smov [#allocation2]  }
   0x2   :  { %s17_s13 = sshll.u32 %s602_s12, 4  ;;  %s18_s13 = int_to_ptr.vmem [resolvable:$true] %s17_s13 }
   0x3   :  { %s566_s14 = scalar_lea.vmem %s18_s13, 8192  ;;  %p571_p1 = scmp.lt.s32.totalorder %s18_s13, %s18_s13 }
   0x4   :  { %p567_p0 = scmp.ne.s32.totalorder %s18_s13, %s566_s14  ;;  %p572_p2 = scmp.lt.s32.totalorder %s566_s14, %s566_s14 }
   0x6   :  { %p573_p3 = por %p572_p2, %p571_p1 }
   0x8   :  { %p574_p4 = pnand %p573_p3, %p567_p0 }
   0xa   :  { %577 = shalt.err (!%p574_p4)
}
   0xb   :  { %s603_s15 = smov 128   ;;  %s604_s16 = smov 8  }
   0xc   :  { %23 = dma.hbm_to_vmem [thread:$0]  %s706_s1, 8192, %s18_s13, [#allocation3], %s603_s15, %s603_s15, %s604_s16  }
   0xd   :  { %598 = dma.done.wait [#allocation3], 8192  }
   0xe   :  { %599 = vsyncadd [#allocation3], 4294959104  ;;  %v605_v0 = vmov 0   ;;  %v606_v1 = vmov 0.0   ;;  %v29_v2 = vld [vmem:[%s705_s0] sm:$0xff]  ;;  %v80_v3 = vld [vmem:[#allocation2 + $0xf8] sm:$0xff]  ;;  %v36_v25 = vlaneseq }
   0xf   :  { %550 = vset.pattern.permute.xlu0 %v605_v0  ;;  %437 = vmatprep.subr.mxu0 %v606_v1  ;;  %v79_v4 = vld [vmem:[#allocation2 + $0xf0] sm:$0xff]  ;;  %v78_v5 = vld [vmem:[#allocation2 + $0xe8] sm:$0xff]  ;;  %v77_v6 = vld [vmem:[#allocation2 + $0xe0] sm:$0xff]  ;;  %v607_v7 = vmov 1   ;;  %vm608_vm0 = vmmov 0   ;;  %s609_s27 = smov [#allocation5]  }
  0x10   :  { %472 = vmatprep.subr.mxu1 %v606_v1  ;;  %33 = vperm.xlu0 %550, %v29_v2   ;;  %v76_v8 = vld [vmem:[#allocation2 + $0xd8] sm:$0xff]  ;;  %v75_v9 = vld [vmem:[#allocation2 + $0xd0] sm:$0xff]  ;;  %v74_v10 = vld [vmem:[#allocation2 + $0xc8] sm:$0xff]  ;;  %v37_v26 = vshrl.u32 %v36_v25, 7  ;;  %s367_s28 = sshll.u32 %s609_s27, 4  ;;  %vm359_vm4 = vcmask 80896   ;;  %s368_s28 = int_to_ptr.vmem [resolvable:$true] %s367_s28 }
  0x11   :  { %438 = vmatpush3.msra.mxu0 %v80_v3  ;;  %469 = vmatprep.mubr.msk.f32.mxu0 %vm608_vm0, %v606_v1  ;;  %v73_v11 = vld [vmem:[#allocation2 + $0xc0] sm:$0xff]  ;;  %v72_v12 = vld [vmem:[#allocation2 + $0xb8] sm:$0xff]  ;;  %v71_v13 = vld [vmem:[#allocation2 + $0xb0] sm:$0xff]  ;;  %s578_s29 = scalar_lea.vmem %s368_s28, 128  ;;  %p583_p6 = scmp.lt.s32.totalorder %s368_s28, %s368_s28 }
  0x12   :  { %439 = vmatprep.subr.mxu0 %v606_v1  ;;  %504 = vmatprep.mubr.msk.f32.mxu1 %vm608_vm0, %v606_v1  ;;  %v70_v14 = vld [vmem:[#allocation2 + $0xa8] sm:$0xff]  ;;  %v69_v15 = vld [vmem:[#allocation2 + $0xa0] sm:$0xff]  ;;  %v68_v16 = vld [vmem:[#allocation2 + $0x98] sm:$0xff]  ;;  %v38_v27 = vsub.s32 0, %v37_v26  ;;  %v47_v28 = vsub.s32 1, %v37_v26  ;;  %p579_p5 = scmp.ne.s32.totalorder %s368_s28, %s578_s29  ;;  %p584_p7 = scmp.lt.s32.totalorder %s578_s29, %s578_s29 }
  0x13   :  { %440 = vmatpush3.msra.mxu0 %v79_v4  ;;  %v67_v17 = vld [vmem:[#allocation2 + $0x90] sm:$0xff]  ;;  %v66_v18 = vld [vmem:[#allocation2 + $0x88] sm:$0xff]  ;;  %v180_v19 = vld [vmem:[#allocation2 + $0x178] sm:$0xff] }
  0x14   :  { %441 = vmatprep.subr.mxu0 %v606_v1  ;;  %551 = vset.pattern.permute.xlu0 %v607_v7  ;;  %v179_v20 = vld [vmem:[#allocation2 + $0x170] sm:$0xff]  ;;  %v65_v21 = vld [vmem:[#allocation2 + $0x80] sm:$0xff]  ;;  %v178_v22 = vld [vmem:[#allocation2 + $0x168] sm:$0xff]  ;;  %p585_p8 = por %p584_p7, %p583_p6 }
  0x15   :  { %442 = vmatpush3.msra.mxu0 %v78_v5  ;;  %42 = vperm.xlu0 %551, %v29_v2   ;;  %v177_v23 = vld [vmem:[#allocation2 + $0x160] sm:$0xff]  ;;  %v176_v24 = vld [vmem:[#allocation2 + $0x158] sm:$0xff]  ;;  %v175_v43 = vld [vmem:[#allocation2 + $0x150] sm:$0xff] }
  0x16   :  { %443 = vmatprep.subr.mxu0 %v606_v1  ;;  %473 = vmatpush3.msra.mxu1 %v180_v19  ;;  %v30_v29 = vld [vmem:[#allocation2] sm:$0xff]  ;;  %v174_v44 = vld [vmem:[#allocation2 + $0x148] sm:$0xff]  ;;  %v172_v46 = vld [vmem:[#allocation2 + $0x138] sm:$0xff]  ;;  %p586_p9 = pnand %p585_p8, %p579_p5 }
  0x17   :  { %444 = vmatpush3.msra.mxu0 %v77_v6  ;;  %474 = vmatprep.subr.mxu1 %v606_v1  ;;  %v39_v31 = vrot.slane %v30_v29, %v38_v27  ;;  %v48_v32 = vrot.slane %v30_v29, %v47_v28  ;;  %v376_v36 = vld [vmem:[%s707_s2] ss:$0 sm:$0xff]  ;;  %v171_v47 = vld [vmem:[#allocation2 + $0x130] sm:$0xff]  ;;  %v170_v48 = vld [vmem:[#allocation2 + $0x128] sm:$0xff] }
  0x18   :  { %445 = vmatprep.subr.mxu0 %v606_v1  ;;  %475 = vmatpush3.msra.mxu1 %v179_v20  ;;  %v173_v45 = vld [vmem:[#allocation2 + $0x140] sm:$0xff]  ;;  %v168_v50 = vld [vmem:[#allocation2 + $0x118] sm:$0xff]  ;;  %v167_v51 = vld [vmem:[#allocation2 + $0x110] sm:$0xff] }
  0x19   :  { %446 = vmatpush3.msra.mxu0 %v76_v8  ;;  %476 = vmatprep.subr.mxu1 %v606_v1  ;;  %v169_v49 = vld [vmem:[#allocation2 + $0x120] sm:$0xff]  ;;  %v166_v52 = vld [vmem:[#allocation2 + $0x108] sm:$0xff]  ;;  %v280_v54 = vld [vmem:[#allocation2 + $0x1f8] sm:$0xff] }
  0x1a   :  { %447 = vmatprep.subr.mxu0 %v606_v1  ;;  %477 = vmatpush3.msra.mxu1 %v178_v22  ;;  %v165_v53 = vld [vmem:[#allocation2 + $0x100] sm:$0xff]  ;;  %v279_v55 = vld [vmem:[#allocation2 + $0x1f0] sm:$0xff]  ;;  %v278_v56 = vld [vmem:[#allocation2 + $0x1e8] sm:$0xff] }
  0x1b   :  { %448 = vmatpush3.msra.mxu0 %v75_v9  ;;  %478 = vmatprep.subr.mxu1 %v606_v1  ;;  %v277_v57 = vld [vmem:[#allocation2 + $0x1e0] sm:$0xff]  ;;  %v276_v58 = vld [vmem:[#allocation2 + $0x1d8] sm:$0xff]  ;;  %v275_v4 = vld [vmem:[#allocation2 + $0x1d0] sm:$0xff] }
  0x1c   :  { %449 = vmatprep.subr.mxu0 %v606_v1  ;;  %479 = vmatpush3.msra.mxu1 %v177_v23  ;;  %v379_v59 = vld [vmem:[%s707_s2 + $0x1] ss:$0 sm:$0xff]  ;;  %v274_v5 = vld [vmem:[#allocation2 + $0x1c8] sm:$0xff]  ;;  %v272_v7 = vld [vmem:[#allocation2 + $0x1b8] sm:$0xff] }
  0x1d   :  { %450 = vmatpush3.msra.mxu0 %v74_v10  ;;  %480 = vmatprep.subr.mxu1 %v606_v1  ;;  %v273_v6 = vld [vmem:[#allocation2 + $0x1c0] sm:$0xff]  ;;  %v271_v8 = vld [vmem:[#allocation2 + $0x1b0] sm:$0xff]  ;;  %v270_v9 = vld [vmem:[#allocation2 + $0x1a8] sm:$0xff] }
  0x1e   :  { %451 = vmatprep.subr.mxu0 %v606_v1  ;;  %481 = vmatpush3.msra.mxu1 %v176_v24  ;;  %v269_v10 = vld [vmem:[#allocation2 + $0x1a0] sm:$0xff] }
  0x1f   :  { %452 = vmatpush3.msra.mxu0 %v73_v11  ;;  %482 = vmatprep.subr.mxu1 %v606_v1  ;;  %v268_v11 = vld [vmem:[#allocation2 + $0x198] sm:$0xff]  ;;  %v385_v23 = vld [vmem:[%s707_s2 + $0x3] ss:$0 sm:$0xff] }
  0x20   :  { %453 = vmatprep.subr.mxu0 %v606_v1  ;;  %483 = vmatpush3.msra.mxu1 %v175_v43 }
  0x21   :  { %454 = vmatpush3.msra.mxu0 %v72_v12  ;;  %484 = vmatprep.subr.mxu1 %v606_v1  ;;  %v267_v12 = vld [vmem:[#allocation2 + $0x190] sm:$0xff] }
  0x22   :  { %455 = vmatprep.subr.mxu0 %v606_v1  ;;  %485 = vmatpush3.msra.mxu1 %v174_v44 }
  0x23   :  { %456 = vmatpush3.msra.mxu0 %v71_v13  ;;  %486 = vmatprep.subr.mxu1 %v606_v1  ;;  %v266_v13 = vld [vmem:[#allocation2 + $0x188] sm:$0xff] }
  0x24   :  { %457 = vmatprep.subr.mxu0 %v606_v1  ;;  %487 = vmatpush3.msra.mxu1 %v173_v45 }
  0x25   :  { %458 = vmatpush3.msra.mxu0 %v70_v14  ;;  %488 = vmatprep.subr.mxu1 %v606_v1  ;;  %v265_v14 = vld [vmem:[#allocation2 + $0x180] sm:$0xff] }
  0x26   :  { %459 = vmatprep.subr.mxu0 %v606_v1  ;;  %489 = vmatpush3.msra.mxu1 %v172_v46 }
  0x27   :  { %460 = vmatpush3.msra.mxu0 %v69_v15  ;;  %490 = vmatprep.subr.mxu1 %v606_v1  ;;  %v382_v15 = vld [vmem:[%s707_s2 + $0x2] ss:$0 sm:$0xff] }
  0x28   :  { %461 = vmatprep.subr.mxu0 %v606_v1  ;;  %491 = vmatpush3.msra.mxu1 %v171_v47 }
  0x29   :  { %462 = vmatpush3.msra.mxu0 %v68_v16  ;;  %492 = vmatprep.subr.mxu1 %v606_v1 }
  0x2a   :  { %463 = vmatprep.subr.mxu0 %v606_v1  ;;  %493 = vmatpush3.msra.mxu1 %v170_v48 }
  0x2b   :  { %464 = vmatpush3.msra.mxu0 %v67_v17  ;;  %494 = vmatprep.subr.mxu1 %v606_v1 }
  0x2c   :  { %465 = vmatprep.subr.mxu0 %v606_v1  ;;  %495 = vmatpush3.msra.mxu1 %v169_v49 }
  0x2d   :  { %466 = vmatpush3.msra.mxu0 %v66_v18  ;;  %496 = vmatprep.subr.mxu1 %v606_v1 }
  0x2e   :  { %467 = vmatprep.subr.mxu0 %v606_v1  ;;  %497 = vmatpush3.msra.mxu1 %v168_v50 }
  0x2f   :  { %468 = vmatpush3.msra.mxu0 %v65_v21  ;;  %498 = vmatprep.subr.mxu1 %v606_v1 }
  0x30   :  { %507 = vmatprep.subr.mxu0 %v606_v1  ;;  %499 = vmatpush3.msra.mxu1 %v167_v51 }
  0x31   :  { %500 = vmatprep.subr.mxu1 %v606_v1 }
  0x32   :  { %501 = vmatpush3.msra.mxu1 %v166_v52 }
  0x33   :  { %502 = vmatprep.subr.mxu1 %v606_v1 }
  0x34   :  { %503 = vmatpush3.msra.mxu1 %v165_v53 }
  0x8b   :  { %v34_v30 = vpop.permute.xlu0 %33 }
  0x8c   :  { %v40_v34 = vmul.f32 %v39_v31, %v34_v30 }
  0x90   :  { %v43_v33 = vpop.permute.xlu0 %42 }
  0x91   :  { %v49_v35 = vmul.f32 %v48_v32, %v43_v33 }
  0x93   :  { %v50_v37 = vadd.f32 %v49_v35, %v40_v34 }
  0x95   :  { %v58_v38 = vadd.f32 %v376_v36, %v50_v37 }
  0x97   :  { %v60_v39 = vmul.f32 1.442695, %v58_v38  ;;  %vm59_vm1 = vcmp.gt.f32.partialorder %v58_v38, 0.0 }
  0x99   :  { %552 = vpow2.f32 %v60_v39 }
  0xa6   :  { %v553_v40 = vpop.eup %552 }
  0xa7   :  { %v377_v41 = vadd.f32 -1.0, %v553_v40 }
  0xa9   :  { %v63_v42 = vsel %vm59_vm1, %v58_v38, %v377_v41 }
  0xaa   :  { %470 = vmatmul.mubr.f32.vlgmr.msra.gmra.mxu0 %v63_v42 }
  0xab   :  { %539 = vmatprep.mubr.msk.f32.mxu0 %vm608_vm0, %v606_v1  ;;  %508 = vmatpush3.msra.mxu0 %v280_v54 }
  0xac   :  { %509 = vmatprep.subr.mxu0 %v606_v1 }
  0xad   :  { %510 = vmatpush3.msra.mxu0 %v279_v55 }
  0xae   :  { %511 = vmatprep.subr.mxu0 %v606_v1 }
  0xaf   :  { %512 = vmatpush3.msra.mxu0 %v278_v56 }
  0xb0   :  { %513 = vmatprep.subr.mxu0 %v606_v1 }
  0xb1   :  { %514 = vmatpush3.msra.mxu0 %v277_v57 }
  0xb2   :  { %515 = vmatprep.subr.mxu0 %v606_v1 }
  0xb3   :  { %516 = vmatpush3.msra.mxu0 %v276_v58 }
  0xb4   :  { %517 = vmatprep.subr.mxu0 %v606_v1 }
  0xb5   :  { %518 = vmatpush3.msra.mxu0 %v275_v4 }
  0xb6   :  { %519 = vmatprep.subr.mxu0 %v606_v1 }
  0xb7   :  { %520 = vmatpush3.msra.mxu0 %v274_v5 }
  0xb8   :  { %521 = vmatprep.subr.mxu0 %v606_v1 }
  0xb9   :  { %522 = vmatpush3.msra.mxu0 %v273_v6 }
  0xba   :  { %523 = vmatprep.subr.mxu0 %v606_v1 }
  0xbb   :  { %524 = vmatpush3.msra.mxu0 %v272_v7 }
  0xbc   :  { %525 = vmatprep.subr.mxu0 %v606_v1 }
  0xbd   :  { %526 = vmatpush3.msra.mxu0 %v271_v8 }
  0xbe   :  { %527 = vmatprep.subr.mxu0 %v606_v1 }
  0xbf   :  { %528 = vmatpush3.msra.mxu0 %v270_v9 }
  0xc0   :  { %529 = vmatprep.subr.mxu0 %v606_v1 }
  0xc1   :  { %530 = vmatpush3.msra.mxu0 %v269_v10 }
  0xc2   :  { %531 = vmatprep.subr.mxu0 %v606_v1 }
  0xc3   :  { %532 = vmatpush3.msra.mxu0 %v268_v11 }
  0xc4   :  { %533 = vmatprep.subr.mxu0 %v606_v1 }
  0xc5   :  { %534 = vmatpush3.msra.mxu0 %v267_v12 }
  0xc6   :  { %535 = vmatprep.subr.mxu0 %v606_v1 }
  0xc7   :  { %536 = vmatpush3.msra.mxu0 %v266_v13 }
  0xc8   :  { %537 = vmatprep.subr.mxu0 %v606_v1 }
  0xc9   :  { %538 = vmatpush3.msra.mxu0 %v265_v14 }
 0x16a   :  { %v155_v60 = vpop.f32.mrf.mxu0 }
 0x16b   :  { %v156_v61 = vadd.f32 %v379_v59, %v155_v60 }
 0x16c   :  { %v471_v62 = vpop.f32.mrf.mxu0 }
 0x16d   :  { %v160_v63 = vmul.f32 1.442695, %v156_v61  ;;  %vm159_vm2 = vcmp.gt.f32.partialorder %v156_v61, 0.0 }
 0x16f   :  { %554 = vpow2.f32 %v160_v63 }
 0x17c   :  { %v555_v0 = vpop.eup %554 }
 0x17d   :  { %v380_v2 = vadd.f32 -1.0, %v555_v0 }
 0x17f   :  { %v163_v3 = vsel %vm159_vm2, %v156_v61, %v380_v2 }
 0x180   :  { %505 = vmatmul.mubr.f32.vlgmr.msra.gmra.mxu1 %v163_v3 }
 0x240   :  { %v255_v16 = vpop.f32.mrf.mxu1 }
 0x241   :  { %v256_v17 = vadd.f32 %v382_v15, %v255_v16 }
 0x242   :  { %v506_v18 = vpop.f32.mrf.mxu1 }
 0x243   :  { %v260_v19 = vmul.f32 1.442695, %v256_v17  ;;  %vm259_vm3 = vcmp.gt.f32.partialorder %v256_v17, 0.0 }
 0x245   :  { %556 = vpow2.f32 %v260_v19 }
 0x252   :  { %v557_v20 = vpop.eup %556 }
 0x253   :  { %v383_v21 = vadd.f32 -1.0, %v557_v20 }
 0x255   :  { %v263_v22 = vsel %vm259_vm3, %v256_v17, %v383_v21 }
 0x256   :  { %540 = vmatmul.mubr.f32.vlgmr.msra.gmra.mxu0 %v263_v22 }
 0x316   :  { %v355_v1 = vpop.f32.mrf.mxu0 }
 0x317   :  { %v356_v24 = vadd.f32 %v385_v23, %v355_v1 }
 0x318   :  { %v541_v25 = vpop.f32.mrf.mxu0 }
 0x319   :  { %360 = vst.msk [vmem:[#allocation5] sm:$0xff] %vm359_vm4, %v356_v24 }
 0x31a   :  { %589 = shalt.err (!%p586_p9)
}
 0x31b   :  { %370 = dma.vmem_to_hbm [thread:$0]  %s368_s28, 128, %s708_s3, [#allocation4]  }
 0x31c   :  { %600 = dma.done.wait [#allocation4], 128  }
 0x31d   :  { %601 = vsyncadd [#allocation4], 4294967168 }
 0x31e   :  { %374 = vsyncpa [#allocation3], 1 }
 0x31f   :  { %375 = vsyncpa [#allocation4], 1 }

</bundles_post_ra>
